<compile_context>
chip_gen: v6e
topology: v6e:2x2x1
jax: 0.10.0
libtpu: 0.0.40
codegen_flags: <defaults>
</compile_context>

<pallas_src>
import jax
import jax.numpy as jnp
from jax.experimental import pallas as pl
from jax.experimental.pallas import tpu as pltpu

LABEL_N_CLASSES = 12  # HTHISpanCLSConfig.label_n_classes
LANE = 128            # TPU vreg lane width


def _span_cls_kernel(x_ref, w_ref, b_ref, o_ref):
    # x_ref: [TM, H]   one pipelined tile of the flattened batch*seq axis
    # w_ref: [H, Cp]   lane-padded weight, VMEM-resident across the grid
    # b_ref: [1, Cp]   lane-padded bias (f32)
    # o_ref: [TM, Cp]  lane-dense output block (f32)
    acc = jnp.dot(x_ref[...], w_ref[...], preferred_element_type=jnp.float32)
    o_ref[...] = (acc + b_ref[...]).astype(o_ref.dtype)


def _round_up(x, m):
    return ((x + m - 1) // m) * m


def span_cls_head(features, weight, bias, *, vmem_x_budget_bytes=8 * 1024 * 1024):
    """Linear span-cls head: features [B, S, H] -> logits [B, S, C] (f32)."""
    B, S, H = features.shape
    C = weight.shape[1]
    M = B * S
    x2d = features.reshape(M, H)

    # Lane-dense output: pad the class dim from C (=12) to a multiple of 128 so
    # output stores are full vst's instead of masked partial stores.  The extra
    # zero columns keep the sliced logits bit-identical.
    Cp = _round_up(C, LANE)
    w_pad = jnp.zeros((H, Cp), features.dtype).at[:, :C].set(
        weight.astype(features.dtype))
    b_pad = jnp.zeros((1, Cp), jnp.float32).at[0, :C].set(bias.astype(jnp.float32))

    # Tile the M axis so the BlockSpec pipeline can double-buffer the [TM, H]
    # activation slabs.  Budget: 2 double-buffered input tiles (plus the
    # resident weight and 2 output tiles) must fit well inside the smallest
    # scoped-VMEM default (v5e: 16 MiB).
    itemsize = jnp.dtype(features.dtype).itemsize
    tm_budget = max(8, vmem_x_budget_bytes // (2 * H * itemsize))
    tm_budget = max(8, (tm_budget // 8) * 8)
    TM = min(_round_up(M, 8), min(tm_budget, 2048))
    if M <= TM:
        TM = M  # single full-extent block (allowed even if M % 8 != 0)
    grid = (pl.cdiv(M, TM),)

    # Headroom for the resident weight + double-buffered x and out tiles.
    vmem_limit = min(
        128 * 1024 * 1024,
        2 * TM * H * itemsize + H * Cp * itemsize + 2 * TM * Cp * 4 + (2 << 20),
    )

    cost = pl.CostEstimate(
        flops=2 * M * H * C,
        transcendentals=0,
        bytes_accessed=M * H * itemsize + H * Cp * itemsize + M * Cp * 4,
    )

    out = pl.pallas_call(
        _span_cls_kernel,
        out_shape=jax.ShapeDtypeStruct((M, Cp), jnp.float32),
        grid=grid,
        in_specs=[
            pl.BlockSpec((TM, H), lambda i: (i, 0)),   # pipelined activation tiles
            pl.BlockSpec((H, Cp), lambda i: (0, 0)),   # weight stays VMEM-resident
            pl.BlockSpec((1, Cp), lambda i: (0, 0)),   # bias stays VMEM-resident
        ],
        out_specs=pl.BlockSpec((TM, Cp), lambda i: (i, 0)),
        compiler_params=pltpu.CompilerParams(
            dimension_semantics=("parallel",),  # independent M tiles -> megacore
            vmem_limit_bytes=vmem_limit,
        ),
        cost_estimate=cost,
    )(x2d, w_pad, b_pad)

    return out[:, :C].reshape(B, S, C)


def hthi_span_cls_forward(features, params):
    """Equivalent of HTHISpanCLS.forward: returns {'label': logits}."""
    return {"label": span_cls_head(features, params["w"], params["b"])}


def init_params(hidden_dim, n_classes, key):
    """Deterministic parameter init (nn.Linear shapes: W [C, H], b [C]).
    W is stored transposed as [H, C] to match the kernel's matmul layout."""
    kw, kb = jax.random.split(key)
    bound = 1.0 / jnp.sqrt(hidden_dim)
    w = jax.random.uniform(kw, (hidden_dim, n_classes), jnp.float32, -bound, bound)
    b = jax.random.uniform(kb, (n_classes,), jnp.float32, -bound, bound)
    return {"w": w, "b": b}


if __name__ == "__main__":
    key = jax.random.PRNGKey(0)
    k_feat, k_param = jax.random.split(key)

    batch, seq, hidden = 2, 8, 32
    features = jax.random.normal(k_feat, (batch, seq, hidden), jnp.float32)
    params = init_params(hidden, LABEL_N_CLASSES, k_param)

    out = hthi_span_cls_forward(features, params)
    logits = jax.block_until_ready(out["label"])

    # Reference check against plain JAX.
    ref = features @ params["w"] + params["b"]
    assert logits.shape == (batch, seq, LABEL_N_CLASSES)
    assert jnp.allclose(logits, ref, atol=1e-5, rtol=1e-5)

    print("KERNEL_OK")
</pallas_src>

<mosaic_0001>
module attributes {stable_mosaic.version = 11 : i64} {
  func.func @_span_cls_kernel(%arg0: i32, %arg1: memref<16x32xf32, #tpu.memory_space<vmem>>, %arg2: memref<32x128xf32, #tpu.memory_space<vmem>>, %arg3: memref<1x128xf32, #tpu.memory_space<vmem>>, %arg4: memref<16x128xf32, #tpu.memory_space<vmem>>) attributes {dimension_semantics = [#tpu.dimension_semantics<parallel>], iteration_bounds = array<i64: 1>, scalar_prefetch = 0 : i64, scratch_operands = 0 : i64, tpu.core_type = #tpu.core_type<tc>, window_params = [{transform_indices = @transform_0, window_bounds = array<i64: 16, 32>}, {pipeline_mode = #tpu.pipeline_mode<synchronous>, transform_indices = @transform_1, window_bounds = array<i64: 32, 128>}, {pipeline_mode = #tpu.pipeline_mode<synchronous>, transform_indices = @transform_2, window_bounds = array<i64: 1, 128>}, {transform_indices = @transform_3, window_bounds = array<i64: 16, 128>}]} {
    %c0 = arith.constant 0 : index
    %c0_0 = arith.constant 0 : index
    %0 = vector.load %arg1[%c0, %c0_0] : memref<16x32xf32, #tpu.memory_space<vmem>>, vector<16x32xf32>
    %c0_1 = arith.constant 0 : index
    %c0_2 = arith.constant 0 : index
    %1 = vector.load %arg2[%c0_1, %c0_2] : memref<32x128xf32, #tpu.memory_space<vmem>>, vector<32x128xf32>
    %cst = arith.constant dense<0.000000e+00> : vector<16x128xf32>
    %2 = tpu.matmul %0, %1, %cst {dimension_numbers = #tpu.dot_dimension_numbers<[1], [0], [0], [1], [0, 0, 1, 1], [], []>} : vector<16x32xf32>, vector<32x128xf32>, vector<16x128xf32> -> vector<16x128xf32>
    %c0_3 = arith.constant 0 : index
    %c0_4 = arith.constant 0 : index
    %3 = vector.load %arg3[%c0_3, %c0_4] : memref<1x128xf32, #tpu.memory_space<vmem>>, vector<1x128xf32>
    %4 = vector.broadcast %3 : vector<1x128xf32> to vector<16x128xf32>
    %5 = arith.addf %2, %4 : vector<16x128xf32>
    %c0_5 = arith.constant 0 : index
    %c0_6 = arith.constant 0 : index
    %6 = vector.load %arg4[%c0_5, %c0_6] : memref<16x128xf32, #tpu.memory_space<vmem>>, vector<16x128xf32>
    tpu.vector_store %arg4[%c0_5, %c0_6], %5 {strides = array<i32>} : memref<16x128xf32, #tpu.memory_space<vmem>>, vector<16x128xf32>,
    return
  }
  func.func @transform_0(%arg0: i32) -> (i32, i32) {
    %c0_i32 = arith.constant 0 : i32
    %c0_i32_0 = arith.constant 0 : i32
    return %arg0, %c0_i32 : i32, i32
  }
  func.func @transform_1(%arg0: i32) -> (i32, i32) {
    %c0_i32 = arith.constant 0 : i32
    %c0_i32_0 = arith.constant 0 : i32
    %c0_i32_1 = arith.constant 0 : i32
    return %c0_i32, %c0_i32_0 : i32, i32
  }
  func.func @transform_2(%arg0: i32) -> (i32, i32) {
    %c0_i32 = arith.constant 0 : i32
    %c0_i32_0 = arith.constant 0 : i32
    %c0_i32_1 = arith.constant 0 : i32
    return %c0_i32, %c0_i32_0 : i32, i32
  }
  func.func @transform_3(%arg0: i32) -> (i32, i32) {
    %c0_i32 = arith.constant 0 : i32
    %c0_i32_0 = arith.constant 0 : i32
    return %arg0, %c0_i32 : i32, i32
  }
}

</mosaic_0001>

<bundles_post_ra>
// kernel: tpu_custom_call.1
= control target key start
LH: loop header
LB: loop body
LE: loop exit
PB: predicated region body
PF: predicated region fallthrough
CT: control target
= control target key end

     0   :  { %8 = vsyncpa [#allocation3], 0  ;;  %s297_s0 = inlined_call_operand.hbm [shape: f32[16,32], index: 0, kind: input, shape index: {}]   ;;  %s298_s1 = inlined_call_operand.hbm [shape: f32[32,128], index: 1, kind: input, shape index: {}]   ;;  %s299_s2 = inlined_call_operand.vmem [shape: f32[1,128], index: 2, kind: input, shape index: {}]   ;;  %s300_s3 = inlined_call_operand.hbm [shape: f32[16,128], index: 3, kind: output, shape index: {}]  }
   0x1   :  { %9 = vsyncpa [#allocation6], 0 }
   0x2   :  { %10 = vsyncpa [#allocation4], 0  ;;  %s249_s12 = smov [#allocation2]  }
   0x3   :  { %s16_s13 = sshll.u32 %s249_s12, 4  ;;  %s17_s13 = int_to_ptr.vmem [resolvable:$true] %s16_s13 }
   0x4   :  { %s191_s14 = scalar_lea.vmem %s17_s13, 256  ;;  %p196_p1 = scmp.lt.s32.totalorder %s17_s13, %s17_s13 }
   0x5   :  { %p192_p0 = scmp.ne.s32.totalorder %s17_s13, %s191_s14  ;;  %p197_p2 = scmp.lt.s32.totalorder %s191_s14, %s191_s14 }
   0x7   :  { %p198_p3 = por %p197_p2, %p196_p1 }
   0x9   :  { %p199_p4 = pnand %p198_p3, %p192_p0 }
   0xb   :  { %202 = shalt.err (!%p199_p4)
}
   0xc   :  { %s250_s15 = smov 128   ;;  %s251_s16 = smov 8  }
   0xd   :  { %22 = dma.hbm_to_vmem [thread:$0]  %s297_s0, 256, %s17_s13, [#allocation3], %s250_s15, %s250_s15, %s251_s16  }
   0xe   :  { %s252_s19 = smov [#allocation5]  }
   0xf   :  { %s28_s20 = sshll.u32 %s252_s19, 4  ;;  %s29_s20 = int_to_ptr.vmem [resolvable:$true] %s28_s20 }
  0x10   :  { %s211_s21 = scalar_lea.vmem %s29_s20, 512  ;;  %p216_p6 = scmp.lt.s32.totalorder %s29_s20, %s29_s20 }
  0x11   :  { %p212_p5 = scmp.ne.s32.totalorder %s29_s20, %s211_s21  ;;  %p217_p7 = scmp.lt.s32.totalorder %s211_s21, %s211_s21 }
  0x13   :  { %p218_p8 = por %p217_p7, %p216_p6 }
  0x15   :  { %p219_p9 = pnand %p218_p8, %p212_p5 }
  0x17   :  { %222 = shalt.err (!%p219_p9)
}
  0x18   :  { %34 = dma.hbm_to_vmem [thread:$0]  %s298_s1, 512, %s29_s20, [#allocation6], %s250_s15, %s250_s15, %s251_s16  }
  0x19   :  { %243 = dma.done.wait [#allocation3], 256  }
  0x1a   :  { %244 = vsyncadd [#allocation3], 4294967040 }
  0x1b   :  { %245 = dma.done.wait [#allocation6], 512  }
  0x1c   :  { %246 = vsyncadd [#allocation6], 4294966784  ;;  %vm56_vm0 = vcmask 261120   ;;  %v48_v0 = vld [vmem:[#allocation5 + $0x18] sm:$0xff]  ;;  %v47_v1 = vld [vmem:[#allocation5 + $0x10] sm:$0xff]  ;;  %s253_s24 = smov [#allocation7]  }
  0x1d   :  { %167 = vmatprep.subr.mxu0 %v48_v0  ;;  %v43_v2 = vld [vmem:[#allocation2] sm:$0xff]  ;;  %v46_v3 = vld [vmem:[#allocation5 + $0x8] sm:$0xff]  ;;  %v45_v4 = vld [vmem:[#allocation5] sm:$0xff]  ;;  %s145_s25 = sshll.u32 %s253_s24, 4  ;;  %s146_s25 = int_to_ptr.vmem [resolvable:$true] %s145_s25 }
  0x1e   :  { %168 = vmatpush3.msra.mxu0 %v48_v0  ;;  %175 = vmatprep.mubr.msk.f32.mxu0 %vm56_vm0, %v43_v2  ;;  %v44_v5 = vld [vmem:[#allocation2 + $0x8] sm:$0xff]  ;;  %v158_v6 = vld [vmem:[%s299_s2] ss:$0 sm:$0xff]  ;;  %s223_s26 = scalar_lea.vmem %s146_s25, 256  ;;  %p228_p11 = scmp.lt.s32.totalorder %s146_s25, %s146_s25 }
  0x1f   :  { %169 = vmatprep.subr.mxu0 %v47_v1  ;;  %p224_p10 = scmp.ne.s32.totalorder %s146_s25, %s223_s26  ;;  %p229_p12 = scmp.lt.s32.totalorder %s223_s26, %s223_s26 }
  0x20   :  { %170 = vmatpush3.msra.mxu0 %v47_v1 }
  0x21   :  { %171 = vmatprep.subr.mxu0 %v46_v3  ;;  %p230_p13 = por %p229_p12, %p228_p11 }
  0x22   :  { %172 = vmatpush3.msra.mxu0 %v46_v3 }
  0x23   :  { %173 = vmatprep.subr.mxu0 %v45_v4  ;;  %p231_p0 = pnand %p230_p13, %p224_p10 }
  0x24   :  { %174 = vmatpush3.msra.mxu0 %v45_v4 }
  0x25   :  { %176 = vmatmul.mubr.msk.f32.vlgmr.msra.gmra.mxu0 %vm56_vm0, %v44_v5 }
  0xe5   :  { %v177_v7 = vpop.f32.mrf.mxu0 }
  0xe6   :  { %v135_v8 = vadd.f32 %v177_v7, %v158_v6 }
  0xe7   :  { %v129_v9 = vpop.f32.mrf.mxu0 }
  0xe8   :  { %139 = vst [vmem:[#allocation7 + $0x8] sm:$0xff] %v135_v8  ;;  %v130_v10 = vadd.f32 %v158_v6, %v129_v9 }
  0xea   :  { %138 = vst [vmem:[#allocation7] sm:$0xff] %v130_v10 }
  0xeb   :  { %234 = shalt.err (!%p231_p0)
}
  0xec   :  { %151 = dma.vmem_to_hbm [thread:$0]  %s146_s25, 256, %s300_s3, [#allocation4], %s250_s15, %s250_s15, %s251_s16  }
  0xed   :  { %247 = dma.done.wait [#allocation4], 256  }
  0xee   :  { %248 = vsyncadd [#allocation4], 4294967040 }
  0xef   :  { %155 = vsyncpa [#allocation3], 1 }
  0xf0   :  { %156 = vsyncpa [#allocation6], 1 }
  0xf1   :  { %157 = vsyncpa [#allocation4], 1 }

</bundles_post_ra>
